<compile_context>
chip_gen: v7x
topology: tpu7x:2x2x1
jax: 0.10.0
libtpu: 0.0.40
codegen_flags: <defaults>
</compile_context>

<pallas_src>
import math
import functools

import jax
import jax.numpy as jnp
from jax.experimental import pallas as pl
from jax.experimental.pallas import tpu as pltpu


# ------------------------- fixed sin/cos table (JAX) --------------------------

def get_fixed_sin_cos_encodings(d_model, max_len):
    assert d_model % 2 == 0
    position = jnp.arange(max_len, dtype=jnp.float32)[:, None]
    div_term = jnp.exp(jnp.arange(0, d_model, 2, dtype=jnp.float32)
                       * (-math.log(10000.0) / d_model))
    pe = jnp.zeros((max_len, d_model), jnp.float32)
    pe = pe.at[:, 0::2].set(jnp.sin(position * div_term))
    pe = pe.at[:, 1::2].set(jnp.cos(position * div_term))
    return pe


# --------------------------------- the kernel ---------------------------------

def rel_pos_enc_kernel(wtab_ref, out_ref, *, q_block, n_groups, g, length_k,
                       max_rel, cross_attn):
    """One output block = (q_block * n_groups, g * d_model).

    wtab_ref: (n_wide_pad, g*d_model) f32 widened table; row r holds the g
    consecutive gathered embedding rows for clipped base distance r.
    """
    rows = out_ref.shape[0]                      # q_block * n_groups
    n_wide_pad = wtab_ref.shape[0]

    # Rebuild (q, k-group) for every output row from the grid position alone
    # (no HBM index input). n_groups is 1 or a power of two -> shift/mask.
    row = jax.lax.broadcasted_iota(jnp.int32, (rows, 1), 0)
    shift = n_groups.bit_length() - 1
    q_local = row >> shift
    kg = row & (n_groups - 1)
    q = pl.program_id(0) * q_block + q_local
    k0 = kg * g

    if cross_attn:
        # dist(q, k0 + t) = (Lk-1-k0) + q - t = base - t ; idx = clip(dist, -M, M)
        base = (length_k - 1 - k0) + q
        r = jnp.clip(base, g - 1, max_rel + g - 1) - (g - 1)
    else:
        # dist(q, k0 + t) = (k0 - q) + t = base + t ; idx = clip(dist, -M, M) + M
        base = k0 - q
        r = jnp.clip(base, -(max_rel + g - 1), max_rel) + (max_rel + g - 1)

    # One-hot gather on the MXU. The iota is only (1, n_wide_pad); the row axis
    # comes from broadcasting against r (rows, 1). Zero-padded widened-table rows
    # are never selected because r < n_wide.
    col = jax.lax.broadcasted_iota(jnp.int32, (1, n_wide_pad), 1)
    onehot = (col == r).astype(jnp.float32)
    out = jnp.dot(onehot, wtab_ref[...], preferred_element_type=jnp.float32)
    out_ref[...] = out.astype(out_ref.dtype)


# ---------------------------------- wrapper ------------------------------------

def _choose_k_group(length_k, d_model, max_width=2048):
    """Pick g (consecutive k positions gathered per one-hot row) so the stored
    block's last dim g*d_model is lane-dense (>=128) but not excessive, with
    n_groups = length_k // g equal to 1 or a power of two (shift/mask in-kernel)."""
    cands = [length_k]
    while cands[-1] % 2 == 0:
        cands.append(cands[-1] // 2)
    cands.sort()                                 # increasing g; Lk // g is 1 or 2^m
    for g in cands:
        if 128 <= g * d_model <= max_width:
            return g
    under = [g for g in cands if g * d_model <= max_width]
    if under:
        return under[-1]
    # TODO(synk): Lk with a huge odd factor and tiny/huge d_model falls back to a
    # wide group (or g=1 below) — still correct, just less ideal layout-wise.
    return cands[0]


def relative_positional_encoding(embeddings_table, length_q, length_k,
                                 max_relative_position, *, cross_attn=False,
                                 out_dtype=jnp.float32, q_block=None,
                                 target_block_bytes=4 * 1024 * 1024):
    """Pallas-TPU equivalent of RelativePositionalEncoding.forward(length_q, length_k).

    Returns (length_q, length_k, d_model); `embeddings_table` is the fixed sin/cos
    buffer or the trainable embedding matrix.
    """
    n_emb, d_model = embeddings_table.shape
    M = int(max_relative_position)
    table = embeddings_table.astype(jnp.float32)

    # ---- k-grouping for a lane-dense output block ----
    g = _choose_k_group(length_k, d_model)
    n_groups = length_k // g
    assert n_groups & (n_groups - 1) == 0        # 1 or power of two (shift/mask)
    lane_width = g * d_model

    # ---- widened table (trace-time constant, constant-folded by XLA) ----
    t = jnp.arange(g, dtype=jnp.int32)[None, :]
    if cross_attn:
        n_wide = M + 1
        r = jnp.arange(n_wide, dtype=jnp.int32)[:, None]
        gather_idx = jnp.clip(r + (g - 1) - t, -M, M)            # in [0, M]
    else:
        n_wide = 2 * M + g
        r = jnp.arange(n_wide, dtype=jnp.int32)[:, None]
        gather_idx = jnp.clip(r - (M + g - 1) + t, -M, M) + M    # in [0, 2M]
    wtab = jnp.take(table, gather_idx, axis=0).reshape(n_wide, lane_width)
    n_wide_pad = ((n_wide + 7) // 8) * 8         # 8-sublane pad: clean MXU operand
    if n_wide_pad != n_wide:
        wtab = jnp.pad(wtab, ((0, n_wide_pad - n_wide), (0, 0)))

    # ---- q tiling: ~target_block_bytes output blocks, >= 2 grid steps when Lq >= 2
    # (both v7x TensorCores busy); rows per block a multiple of the sublane tile.
    out_dtype = jnp.dtype(out_dtype)
    sublane = {4: 8, 2: 16, 1: 32}.get(out_dtype.itemsize, 8)
    rows_total = length_q * n_groups
    q_bytes = n_groups * lane_width * out_dtype.itemsize         # output bytes per q

    if q_block is None:
        q_block = max(1, target_block_bytes // q_bytes)
        if q_block >= length_q and length_q >= 2:
            q_block = pl.cdiv(length_q, 2)
    q_block = max(1, min(int(q_block), length_q))
    rows_per_block = q_block * n_groups
    if rows_per_block % sublane != 0 and rows_per_block != rows_total:
        mult = sublane // math.gcd(n_groups, sublane)
        q_block = max(mult, (q_block // mult) * mult)
        if q_block >= length_q:
            q_block = length_q
        rows_per_block = q_block * n_groups
    grid = (pl.cdiv(length_q, q_block),)         # ragged last block handled by Pallas

    kernel = functools.partial(
        rel_pos_enc_kernel, q_block=q_block, n_groups=n_groups, g=g,
        length_k=length_k, max_rel=M, cross_attn=cross_attn)

    out_bytes = rows_total * lane_width * out_dtype.itemsize
    cost = pl.CostEstimate(
        flops=2 * rows_total * n_wide_pad * lane_width,
        transcendentals=0,
        bytes_accessed=out_bytes + int(wtab.size) * 4)

    out_flat = pl.pallas_call(
        kernel,
        out_shape=jax.ShapeDtypeStruct((rows_total, lane_width), out_dtype),
        grid=grid,
        in_specs=[pl.BlockSpec((n_wide_pad, lane_width), lambda i: (0, 0))],
        out_specs=pl.BlockSpec((rows_per_block, lane_width), lambda i: (i, 0)),
        compiler_params=pltpu.CompilerParams(
            dimension_semantics=("parallel",)),
        cost_estimate=cost,
    )(wtab)

    # flat row (q*n_groups + kg) holds k = kg*g .. kg*g+g-1 -> contiguous reshape
    return out_flat.reshape(length_q, length_k, d_model)


# ----------------------------- pure-JAX reference ------------------------------

def _reference(table, length_q, length_k, max_rel, cross_attn):
    if cross_attn:
        dist = (jnp.arange(length_k - 1, -1, -1)[None, :]
                + jnp.arange(length_q)[:, None])
    else:
        dist = jnp.arange(length_k)[None, :] - jnp.arange(length_q)[:, None]
    dist = jnp.clip(dist, -max_rel, max_rel)
    if not cross_attn:
        dist = dist + max_rel
    return jnp.take(table.astype(jnp.float32), dist, axis=0)


# ------------------------------------ main --------------------------------------

if __name__ == "__main__":
    max_rel = 4
    d_model = 32
    length_q, length_k = 8, 8

    # Non-trainable path (module default): fixed sin/cos buffer (2*max_rel+1, d_model).
    fixed_table = get_fixed_sin_cos_encodings(d_model, 2 * max_rel + 1)

    out_self = relative_positional_encoding(fixed_table, length_q, length_k,
                                            max_rel, cross_attn=False)
    out_cross = relative_positional_encoding(fixed_table, length_q, length_k,
                                             max_rel, cross_attn=True)

    # Trainable path: same kernel, just a different (learned) table.
    key = jax.random.PRNGKey(0)
    train_table = 0.1 * jax.random.normal(key, (2 * max_rel + 1, d_model),
                                          jnp.float32)
    out_train = relative_positional_encoding(train_table, length_q, length_k,
                                             max_rel, cross_attn=False)

    # bf16 output variant (for bf16 consumers; halves the HBM writeback).
    out_bf16 = relative_positional_encoding(fixed_table, length_q, length_k,
                                            max_rel, cross_attn=False,
                                            out_dtype=jnp.bfloat16)

    jax.block_until_ready((out_self, out_cross, out_train, out_bf16))

    ref_self = _reference(fixed_table, length_q, length_k, max_rel, False)
    ref_cross = _reference(fixed_table, length_q, length_k, max_rel, True)
    ref_train = _reference(train_table, length_q, length_k, max_rel, False)

    assert out_self.shape == (length_q, length_k, d_model)
    assert out_cross.shape == (length_q, length_k, d_model)
    assert jnp.allclose(out_self, ref_self, atol=1e-5, rtol=1e-5), "self mismatch"
    assert jnp.allclose(out_cross, ref_cross, atol=1e-5, rtol=1e-5), "cross mismatch"
    assert jnp.allclose(out_train, ref_train, atol=1e-5, rtol=1e-5), "trainable mismatch"
    assert jnp.allclose(out_bf16.astype(jnp.float32), ref_self,
                        atol=1e-2, rtol=1e-2), "bf16 output mismatch"

    print("KERNEL_OK")
</pallas_src>

<mosaic_0001>
module attributes {stable_mosaic.version = 11 : i64} {
  func.func @rel_pos_enc_kernel(%arg0: i32, %arg1: memref<16x128xf32, #tpu.memory_space<vmem>>, %arg2: memref<8x128xf32, #tpu.memory_space<vmem>>) attributes {dimension_semantics = [#tpu.dimension_semantics<parallel>], iteration_bounds = array<i64: 2>, scalar_prefetch = 0 : i64, scratch_operands = 0 : i64, tpu.core_type = #tpu.core_type<tc>, window_params = [{pipeline_mode = #tpu.pipeline_mode<synchronous>, transform_indices = @transform_0, window_bounds = array<i64: 16, 128>}, {transform_indices = @transform_1, window_bounds = array<i64: 8, 128>}]} {
    %0 = tpu.iota {dimensions = array<i32: 0>} : vector<8x1xi32>
    %c1_i32 = arith.constant 1 : i32
    %1 = vector.broadcast %c1_i32 : i32 to vector<8x1xi32>
    %2 = arith.shrsi %0, %1 : vector<8x1xi32>
    %c1_i32_0 = arith.constant 1 : i32
    %3 = vector.broadcast %c1_i32_0 : i32 to vector<8x1xi32>
    %4 = arith.andi %0, %3 : vector<8x1xi32>
    %c4_i32 = arith.constant 4 : i32
    %5 = arith.muli %arg0, %c4_i32 : i32
    %6 = vector.broadcast %5 : i32 to vector<8x1xi32>
    %7 = arith.addi %6, %2 : vector<8x1xi32>
    %c4_i32_1 = arith.constant 4 : i32
    %8 = vector.broadcast %c4_i32_1 : i32 to vector<8x1xi32>
    %9 = arith.muli %4, %8 : vector<8x1xi32>
    %10 = arith.subi %9, %7 : vector<8x1xi32>
    %c-7_i32 = arith.constant -7 : i32
    %c4_i32_2 = arith.constant 4 : i32
    %11 = vector.broadcast %c-7_i32 : i32 to vector<8x1xi32>
    %12 = arith.maxsi %11, %10 : vector<8x1xi32>
    %13 = vector.broadcast %c4_i32_2 : i32 to vector<8x1xi32>
    %14 = arith.minsi %13, %12 : vector<8x1xi32>
    %c7_i32 = arith.constant 7 : i32
    %15 = vector.broadcast %c7_i32 : i32 to vector<8x1xi32>
    %16 = arith.addi %14, %15 : vector<8x1xi32>
    %17 = tpu.iota {dimensions = array<i32: 1>} : vector<1x16xi32>
    %18 = vector.broadcast %17 : vector<1x16xi32> to vector<8x16xi32>
    %19 = vector.broadcast %16 : vector<8x1xi32> to vector<8x16xi32>
    %20 = arith.cmpi eq, %18, %19 : vector<8x16xi32>
    %21 = arith.extui %20 : vector<8x16xi1> to vector<8x16xi32>
    %22 = arith.sitofp %21 : vector<8x16xi32> to vector<8x16xf32>
    %c0 = arith.constant 0 : index
    %c0_3 = arith.constant 0 : index
    %23 = vector.load %arg1[%c0, %c0_3] : memref<16x128xf32, #tpu.memory_space<vmem>>, vector<16x128xf32>
    %cst = arith.constant dense<0.000000e+00> : vector<8x128xf32>
    %24 = tpu.matmul %22, %23, %cst {dimension_numbers = #tpu.dot_dimension_numbers<[1], [0], [0], [1], [0, 0, 1, 1], [], []>} : vector<8x16xf32>, vector<16x128xf32>, vector<8x128xf32> -> vector<8x128xf32>
    %c0_4 = arith.constant 0 : index
    %c0_5 = arith.constant 0 : index
    %25 = vector.load %arg2[%c0_4, %c0_5] : memref<8x128xf32, #tpu.memory_space<vmem>>, vector<8x128xf32>
    tpu.vector_store %arg2[%c0_4, %c0_5], %24 {strides = array<i32>} : memref<8x128xf32, #tpu.memory_space<vmem>>, vector<8x128xf32>,
    return
  }
  func.func @transform_0(%arg0: i32) -> (i32, i32) {
    %c0_i32 = arith.constant 0 : i32
    %c0_i32_0 = arith.constant 0 : i32
    %c0_i32_1 = arith.constant 0 : i32
    return %c0_i32, %c0_i32_0 : i32, i32
  }
  func.func @transform_1(%arg0: i32) -> (i32, i32) {
    %c0_i32 = arith.constant 0 : i32
    %c0_i32_0 = arith.constant 0 : i32
    return %arg0, %c0_i32 : i32, i32
  }
}

</mosaic_0001>

<bundles_post_ra>
// kernel: tpu_custom_call.1
= control target key start
LH: loop header
LB: loop body
LE: loop exit
PB: predicated region body
PF: predicated region fallthrough
CT: control target
= control target key end

     0   :  { %6 = vsyncpa [#allocation3], 0  ;;  %s604_s0 = inlined_call_operand.hbm [shape: f32[16,128], index: 0, kind: input, shape index: {}]   ;;  %s605_s1 = inlined_call_operand.hbm [shape: f32[16,128], index: 1, kind: output, shape index: {}]  }
   0x1   :  { %7 = vsyncpa [#allocation4], 0 }
   0x2   :  { %9 = vsyncpa [#allocation4 + $0x1], 0  ;;  %s473_s6 = smov 0   ;;  %s475_s7 = smov 0  }
   0x3   :  { %s477_s8 = smov 0   ;;  %s479_s9 = smov 0  }
   0x4 LB: > { %s494_s10 = sadd.s32 4294967295, %s454_s9   ;;  %s279_s11 = sadd.s32 4294967294, %s454_s9   ;;  %s454_s9 = sphi %s479_s9, %s621_s9   ;;  %s450_s8 = sphi %s477_s8, %s620_s8   ;;  %s446_s7 = sphi %s475_s7, %s619_s7   ;;  %s442_s6 = sphi %s473_s6, %s618_s6  }
   0x5   : > { %s498_s12 = sadd.s32 1, %s454_s9   ;;  %s43_s13 = sadd.s32 1, %s450_s8 }
   0x6   : > { %s40_s14 = ssub.s32 %s454_s9, %s498_s12  ;;  %p53_p0 = scmp.ne.s32.totalorder %s450_s8, %s446_s7 }
   0x7   : > { %p41_p1 = scmp.eq.s32.totalorder %s40_s14, 0  ;;  %p54_p2 = scmp.eq.s32.totalorder %s494_s10, 1 }
   0x8   : > { %p59_p3 = scmp.ne.s32.totalorder %s446_s7, %s442_s6  ;;  %p60_p4 = scmp.eq.s32.totalorder %s279_s11, 1 }
   0x9   : > { %s509_s15 = scalar_select %p41_p1, %s450_s8, %s43_s13  }
   0xa   : > { %p511_p5 = por %p54_p2, %p53_p0  ;;  %p515_p6 = por %p60_p4, %p59_p3 }
   0xb   : > { %p280_p7 = scmp.ge.s32.totalorder %s454_s9, 1  ;;  %p67_p8 = scmp.lt.s32.totalorder %s454_s9, 3 }
   0xc   : > { %s609_s16 = scalar_select %p511_p5, 1, 0 }
   0xd   : > { %s610_s17 = scalar_select %p515_p6, 1, 0 }
   0xe   : > { %p606_p9 = scmp.eq.s32.totalorder %s494_s10, 0  ;;  %p522_p10 = pnand %p280_p7, %p67_p8 }
   0xf   : > { %s456_s19 = smov [#allocation2]   ;;  %s360_s24 = scalar_lea.hbm %s604_s0, 256 }
  0x10   : > { %s611_s18 = scalar_select %p522_p10, 1, 0 }
  0x11   : > { %s79_s20 = sshll.u32 %s456_s19, 4  ;;  %p311_p11 = pneg %p522_p10  ;;  %s80_s20 = int_to_ptr.vmem [resolvable:$true] %s79_s20 }
  0x12   : > { %p361_p13 = scmp.ne.s32.totalorder %s604_s0, %s360_s24  ;;  %p367_p3 = scmp.lt.u32.totalorder %s360_s24, %s604_s0 }
  0x13   : > { %p530_p12 = pnand %p606_p9, %p311_p11 }
  0x15   : > { %p362_p0 = pneg %p530_p12 }
  0x17   : > { %p363_p1 = pnand %p362_p0, %p361_p13 }
  0x19   : > { %p364_p2 = pneg %p363_p1 }
  0x1b   : > { %p369_p4 = pnand %p367_p3, %p364_p2 }
  0x1d   : > { %372 = shalt.err (!%p369_p4)
}
  0x1e   : > { %s373_s29 = scalar_lea.vmem %s80_s20, 256  ;;  %p381_p9 = scmp.lt.s32.totalorder %s80_s20, %s80_s20 }
  0x1f   : > { %p374_p7 = scmp.ne.s32.totalorder %s80_s20, %s373_s29  ;;  %p382_p6 = scmp.lt.s32.totalorder %s373_s29, %s373_s29 }
  0x21   : > { %p376_p8 = pnand %p374_p7, %p362_p0  ;;  %p383_p5 = por %p382_p6, %p381_p9 }
  0x23   : > { %p377_p11 = pneg %p376_p8 }
  0x25   : > { %p384_p10 = pnand %p383_p5, %p377_p11 }
  0x27   : > { %387 = shalt.err (!%p384_p10)
}
  0x28   : > { %s457_s30 = smov 128   ;;  %s458_s2 = smov 8  }
  0x29   : > { %314 = dma.hbm_to_vmem [thread:$0]  (!%p530_p12), %s604_s0, 256, %s80_s20, [#allocation3], %s457_s30, %s457_s30, %s458_s2  }
  0x2a   : > { %p613_p13 = scmp.ne.s32.totalorder %s611_s18, 0 }
  0x2b   : > { %p614_p1 = scmp.eq.s32.totalorder (!%p613_p13), %s494_s10, 0 }
  0x2c   : > { %95 = sbr.rel (%p613_p13) target bundleno = 296 (0x128), region = 24 }
  0x33   : > { %433 = dma.done.wait (%p614_p1), [#allocation3], 256   ;;  %p615_p0 = pmov %p614_p1 }
  0x34   : > { %v110_v0 = vlaneseq  ;;  %s285_s5 = sshll.u32 %s494_s10, 2  ;;  %v459_v1 = vmov 0.0|0.0   ;;  %vm460_vm0 = vmmov 0   ;;  %v461_v2 = vmov 0.0   ;;  %v129_v9 = vld [vmem:[#allocation2] sm:$0xff]  ;;  %v130_v10 = vld [vmem:[#allocation2 + $0x8] sm:$0xff] }
  0x35   : > { %435 = vsyncadd (%p615_p0), [#allocation3], 4294967040  ;;  %302 = vmatprep.subr.bf16.mxu0 %v459_v1  ;;  %299 = vmatprep.mubr.msk.f32.mxu0 %vm460_vm0, %v461_v2  ;;  %v115_v4 = vstv %s285_s5  ;;  %v303_v11 = vpack.c.bf16 %v130_v10, %v129_v9  ;;  %vm131_vm3 = vcmask 130048   ;;  %s107_s11 = sand.u32 1, %s446_s7   ;;  %s289_s19 = sshll.u32 %s494_s10, 7 }
  0x36   : > { %v111_v3 = vshrl.u32 %v110_v0, 7  ;;  %v125_v14 = vand.u32 127, %v110_v0  ;;  %s284_s13 = sshll.u32 %s107_s11, 3  ;;  %s564_s22 = scalar_lea.hbm %s605_s1, %s289_s19 }
  0x37   : > { %304 = vmatpush3.bf16.msra.mxu0 %v303_v11  ;;  %s109_s14 = scalar_lea.vmem [#allocation5], %s284_s13  ;;  %s207_s23 = scalar_lea.sflag [#allocation4], %s107_s11 }
  0x38   : > { %v112_v5 = vshra.s32 %v111_v3, 1  ;;  %v113_v6 = vand.u32 1, %v111_v3  ;;  %s220_s18 = sshll.u32 %s109_s14, 4  ;;  %p616_p6 = scmp.ne.s32.totalorder %s609_s16, 0  ;;  %s559_s18 = int_to_ptr.vmem [resolvable:$true] %s220_s18 }
  0x39   : > { %s388_s24 = scalar_lea.vmem %s559_s18, 128  ;;  %s462_s10 = smov [#allocation5]  }
  0x3a   : > { %v116_v7 = vadd.s32 %v115_v4, %v112_v5  ;;  %v117_v8 = vmul.u32 4, %v113_v6  ;;  %p389_p5 = scmp.ne.s32.totalorder %s559_s18, %s388_s24  ;;  %s392_s25 = sshll.u32 %s462_s10, 4  ;;  %s393_s25 = int_to_ptr.vmem [resolvable:$false] %s392_s25 }
  0x3b   : > { %s394_s26 = scalar_lea.vmem %s393_s25, 256  ;;  %p395_p12 = scmp.lt.s32.totalorder %s559_s18, %s393_s25 }
  0x3c   : > { %v118_v12 = vsub.s32 %v117_v8, %v116_v7  ;;  %p390_p9 = pnand %p389_p5, %p616_p6  ;;  %p396_p2 = scmp.lt.s32.totalorder %s394_s26, %s388_s24 }
  0x3e   : > { %vm119_vm1 = vcmp.gt.s32.totalorder %v118_v12, 4294967289  ;;  %p391_p10 = pneg %p390_p9  ;;  %p397_p3 = por %p396_p2, %p395_p12 }
  0x3f   : > { %v120_v13 = vsel %vm119_vm1, %v118_v12, 4294967289 }
  0x40   : > { %vm121_vm2 = vcmp.lt.s32.totalorder %v120_v13, 4  ;;  %p398_p4 = pnand %p397_p3, %p391_p10 }
  0x41   : > { %v122_v15 = vsel %vm121_vm2, %v120_v13, 4 }
  0x42   : > { %v123_v16 = vadd.s32 7, %v122_v15 }
  0x44   : > { %vm126_vm4 = vcmp.eq.s32.totalorder %v125_v14, %v123_v16 }
  0x45   : > { %v286_v17 = vsel %vm126_vm4, 1.0, %v461_v2 }
  0x46   : > { %300 = vmatmul.mubr.msk.f32.vlgmr.msra.gmra.mrb[0].mxu0 %vm131_vm3, %v286_v17 }
 0x119   : > { %v201_v18 = vpop.f32.mrb[0].mxu0 }
 0x11a   : > { %205 = vst [vmem:[%s109_s14] sm:$0xff] %v201_v18  ;;  %v301_v19 = vpop.f32.mrb[1].mxu0 }
 0x11b   : > { %401 = shalt.err (!%p398_p4)
}
 0x11c   : > { %s402_s27 = scalar_lea.hbm %s564_s22, 128  ;;  %s406_s30 = scalar_lea.hbm %s605_s1, 256 }
 0x11d   : > { %p403_p7 = scmp.ne.s32.totalorder %s564_s22, %s402_s27  ;;  %p407_p13 = scmp.lt.u32.totalorder %s564_s22, %s605_s1 }
 0x11e   : > { %p408_p1 = scmp.lt.u32.totalorder %s406_s30, %s402_s27  ;;  %p410_p5 = scmp.lt.u32.totalorder %s402_s27, %s564_s22 }
 0x11f   : > { %p404_p8 = pnand %p403_p7, %p616_p6 }
 0x120   : > { %p409_p0 = por %p408_p1, %p407_p13 }
 0x121   : > { %p405_p11 = pneg %p404_p8 }
 0x122   : > { %p411_p9 = por %p410_p5, %p409_p0 }
 0x124   : > { %p412_p10 = pnand %p411_p9, %p405_p11 }
 0x126   : > { %415 = shalt.err (!%p412_p10)
}
 0x127   : > { %309 = dma.vmem_to_hbm [thread:$0]  (%p616_p6), %s559_s18, 128, %s564_s22, %s207_s23  }
 0x128 PF: > { %p321_p12 = scmp.ge.s32.totalorder %s454_s9, 2  ;;  %s232_s4 = sand.u32 1, %s442_s6  }
 0x129   : > { %p617_p2 = scmp.ne.s32.totalorder %s610_s17, 0  ;;  %s233_s5 = scalar_lea.sflag [#allocation4], %s232_s4 }
 0x12b   : > { %p316_p3 = pnand %p321_p12, %p617_p2 }
 0x12d   : > { %437 = dma.done.wait (!%p316_p3), %s233_s5, 128  }
 0x12e   : > { %439 = vsyncadd (!%p316_p3), %s233_s5, 4294967168  ;;  %p12_p4 = scmp.ge.s32.totalorder %s498_s12, 4   ;;  %s618_s6 = smov %s446_s7 }
 0x12f   : > { %s619_s7 = smov %s450_s8  ;;  %s620_s8 = smov %s509_s15 }
 0x130   : > { %s621_s9 = smov %s498_s12  ;;  %14 = sbr.rel (!%p12_p4) target bundleno = 4 (0x4), region = 61 }
 0x137   :  { %238 = vsyncpa [#allocation3], 1 }
 0x138   :  { %240 = vsyncpa [#allocation3 + $0x1], 1 }
 0x139   :  { %241 = vsyncpa [#allocation4], 1 }
 0x13a   :  { %243 = vsyncpa [#allocation4 + $0x1], 1 }

</bundles_post_ra>
